<compile_context>
chip_gen: v7x
topology: tpu7x:2x2x1
jax: 0.10.0
libtpu: 0.0.40
codegen_flags: <defaults>
</compile_context>

<pallas_src>
import jax
import jax.numpy as jnp
from jax import lax
from jax.experimental import pallas as pl
from jax.experimental.pallas import tpu as pltpu


def pam_proj_kernel(x_ref, wq_ref, wk_ref, wv_ref, bq_ref, bk_ref, bv_ref,
                    q_ref, k_ref, v_ref):
    # x_ref: (1, C, tn) column slab of one batch element.
    x = x_ref[0]                                              # (C, tn), input dtype

    def proj(w_ref, b_ref):
        # 1x1 conv == channel matmul; accumulate in f32 on the MXU.
        acc = jnp.dot(w_ref[...], x, preferred_element_type=jnp.float32)
        return acc + b_ref[...].astype(jnp.float32)           # (Co, tn)

    q_ref[0] = proj(wq_ref, bq_ref).astype(q_ref.dtype)
    k_ref[0] = proj(wk_ref, bk_ref).astype(k_ref.dtype)
    v_ref[0] = proj(wv_ref, bv_ref).astype(v_ref.dtype)


def pam_attn_kernel(gamma_ref, q_ref, k_ref, v_ref, x_ref, o_ref):
    # q_ref: (1, Cq, tq) query tile; k_ref: (1, Cq, N); v_ref: (1, C, N);
    # x_ref: (1, C, tq) residual tile; o_ref: (1, C, tq).
    q = q_ref[0]                                              # (Cq, tq)
    k = k_ref[0]                                              # (Cq, N)

    # energy[i, j] = sum_c q[c, i] * k[c, j]   (proj_query @ proj_key).
    # Only the small query tile gets transposed; the big (C, N)/(tq, N)
    # operands are never transposed/copied.
    energy = jnp.dot(q.T, k, preferred_element_type=jnp.float32)      # (tq, N)

    # Row softmax: single max reduction, reciprocal on the (otherwise idle) EUP.
    m = jnp.max(energy, axis=-1, keepdims=True)
    p = jnp.exp(energy - m)
    attn = p * pl.reciprocal(jnp.sum(p, axis=-1, keepdims=True), approx=True)

    # out[c, i] = sum_j v[c, j] * attn[i, j]   (proj_value @ attention^T):
    # contract the trailing axes of both operands -> no transposed attn copy.
    v = v_ref[0]                                              # (C, N)
    out = lax.dot_general(v, attn.astype(v.dtype),
                          (((1,), (1,)), ((), ())),
                          preferred_element_type=jnp.float32)          # (C, tq)

    gamma = gamma_ref[0]
    o_ref[0] = (gamma * out + x_ref[0].astype(jnp.float32)).astype(o_ref.dtype)


def _pick_tile(n):
    # Largest lane-dense tile (multiple of 128) dividing N; otherwise full N
    # (block dim equal to the full array dim is always legal).
    for t in (512, 256, 128):
        if n % t == 0:
            return t
    return n


def pam_module(x, wq, bq, wk, bk, wv, bv, gamma):
    """Position attention module (PAM) forward.

    x:  (B, C, H, W)
    wq, wk: (C//8, C)   bq, bk: (C//8,)
    wv:     (C, C)      bv:     (C,)
    gamma:  scalar (initialized to 0 in the PyTorch module)
    returns: (B, C, H, W)
    """
    B, C, H, W = x.shape
    N = H * W
    Cq = wq.shape[0]
    dt = x.dtype
    x_flat = x.reshape(B, C, N)

    tn = _pick_tile(N)
    n_tiles = N // tn

    gamma_arr = jnp.asarray(gamma, jnp.float32).reshape(1)
    bq2 = bq.reshape(Cq, 1).astype(jnp.float32)
    bk2 = bk.reshape(Cq, 1).astype(jnp.float32)
    bv2 = bv.reshape(C, 1).astype(jnp.float32)

    # ---- 1x1 conv projections (query / key / value) -------------------------
    q_flat, k_flat, v_flat = pl.pallas_call(
        pam_proj_kernel,
        out_shape=(
            jax.ShapeDtypeStruct((B, Cq, N), dt),
            jax.ShapeDtypeStruct((B, Cq, N), dt),
            jax.ShapeDtypeStruct((B, C, N), dt),
        ),
        grid_spec=pltpu.PrefetchScalarGridSpec(
            num_scalar_prefetch=0,
            grid=(B, n_tiles),
            in_specs=[
                pl.BlockSpec((1, C, tn), lambda b, j: (b, 0, j)),   # x slab
                pl.BlockSpec((Cq, C), lambda b, j: (0, 0)),          # Wq
                pl.BlockSpec((Cq, C), lambda b, j: (0, 0)),          # Wk
                pl.BlockSpec((C, C), lambda b, j: (0, 0)),           # Wv
                pl.BlockSpec((Cq, 1), lambda b, j: (0, 0)),          # bq
                pl.BlockSpec((Cq, 1), lambda b, j: (0, 0)),          # bk
                pl.BlockSpec((C, 1), lambda b, j: (0, 0)),           # bv
            ],
            out_specs=(
                pl.BlockSpec((1, Cq, tn), lambda b, j: (b, 0, j)),
                pl.BlockSpec((1, Cq, tn), lambda b, j: (b, 0, j)),
                pl.BlockSpec((1, C, tn), lambda b, j: (b, 0, j)),
            ),
        ),
        compiler_params=pltpu.CompilerParams(
            dimension_semantics=("parallel", "parallel"),
            vmem_limit_bytes=32 * 1024 * 1024),
    )(x_flat, wq, wk, wv, bq2, bk2, bv2)

    # ---- spatial (N x N) attention + residual --------------------------------
    tq = tn
    out_flat = pl.pallas_call(
        pam_attn_kernel,
        out_shape=jax.ShapeDtypeStruct((B, C, N), dt),
        grid_spec=pltpu.PrefetchScalarGridSpec(
            num_scalar_prefetch=0,
            grid=(B, N // tq),
            in_specs=[
                pl.BlockSpec(memory_space=pltpu.MemorySpace.SMEM),   # gamma
                pl.BlockSpec((1, Cq, tq), lambda b, j: (b, 0, j)),   # Q tile
                pl.BlockSpec((1, Cq, N), lambda b, j: (b, 0, 0)),    # K (all keys)
                pl.BlockSpec((1, C, N), lambda b, j: (b, 0, 0)),     # V (all values)
                pl.BlockSpec((1, C, tq), lambda b, j: (b, 0, j)),    # x residual tile
            ],
            out_specs=pl.BlockSpec((1, C, tq), lambda b, j: (b, 0, j)),
        ),
        compiler_params=pltpu.CompilerParams(
            dimension_semantics=("parallel", "parallel"),
            vmem_limit_bytes=64 * 1024 * 1024),
    )(gamma_arr, q_flat, k_flat, v_flat, x_flat)

    return out_flat.reshape(B, C, H, W)


def pam_reference(x, wq, bq, wk, bk, wv, bv, gamma):
    """Pure-JAX reference mirroring the PyTorch PAM_Module forward exactly."""
    B, C, H, W = x.shape
    N = H * W
    xf = x.reshape(B, C, N)
    q = jnp.einsum("oc,bcn->bon", wq, xf) + bq[None, :, None]   # (B, C//8, N)
    k = jnp.einsum("oc,bcn->bon", wk, xf) + bk[None, :, None]   # (B, C//8, N)
    v = jnp.einsum("oc,bcn->bon", wv, xf) + bv[None, :, None]   # (B, C,    N)
    energy = jnp.einsum("bci,bcj->bij", q, k)                   # (B, N, N)
    attn = jax.nn.softmax(energy, axis=-1)
    out = jnp.einsum("bcj,bij->bci", v, attn)                   # (B, C, N)
    return gamma * out.reshape(B, C, H, W) + x


if __name__ == "__main__":
    key = jax.random.PRNGKey(0)
    kx, kwq, kwk, kwv, kbq, kbk, kbv = jax.random.split(key, 7)

    # PAM needs C // 8 >= 1 query/key channels; C = 64 gives Cq = 8 (sublane
    # aligned) while keeping the test tiny (N = 256).
    B, C, H, W = 2, 64, 16, 16
    Cq = C // 8

    x = jax.random.normal(kx, (B, C, H, W), dtype=jnp.float32)
    scale = 1.0 / jnp.sqrt(jnp.float32(C))
    wq = jax.random.normal(kwq, (Cq, C), jnp.float32) * scale
    wk = jax.random.normal(kwk, (Cq, C), jnp.float32) * scale
    wv = jax.random.normal(kwv, (C, C), jnp.float32) * scale
    bq = jax.random.normal(kbq, (Cq,), jnp.float32) * 0.1
    bk = jax.random.normal(kbk, (Cq,), jnp.float32) * 0.1
    bv = jax.random.normal(kbv, (C,), jnp.float32) * 0.1

    # gamma is initialized to zeros(1) in the module __init__.
    gamma0 = jnp.zeros((), jnp.float32)
    out0 = pam_module(x, wq, bq, wk, bk, wv, bv, gamma0)
    jax.block_until_ready(out0)
    ref0 = pam_reference(x, wq, bq, wk, bk, wv, bv, gamma0)
    assert jnp.allclose(out0, ref0, atol=1e-5, rtol=1e-5), "mismatch (gamma=0)"

    # Nonzero gamma exercises the attention hot path (approx EUP reciprocal ->
    # slightly looser tolerance than pure f32).
    gamma1 = jnp.float32(0.5)
    out1 = pam_module(x, wq, bq, wk, bk, wv, bv, gamma1)
    jax.block_until_ready(out1)
    ref1 = pam_reference(x, wq, bq, wk, bk, wv, bv, gamma1)
    assert jnp.allclose(out1, ref1, atol=3e-3, rtol=3e-3), "mismatch (gamma!=0)"

    print("KERNEL_OK")
</pallas_src>

<mosaic_0001>
module attributes {stable_mosaic.version = 11 : i64} {
  func.func @pam_proj_kernel(%arg0: i32, %arg1: i32, %arg2: memref<1x64x256xf32, #tpu.memory_space<vmem>>, %arg3: memref<8x64xf32, #tpu.memory_space<vmem>>, %arg4: memref<8x64xf32, #tpu.memory_space<vmem>>, %arg5: memref<64x64xf32, #tpu.memory_space<vmem>>, %arg6: memref<8x1xf32, #tpu.memory_space<vmem>>, %arg7: memref<8x1xf32, #tpu.memory_space<vmem>>, %arg8: memref<64x1xf32, #tpu.memory_space<vmem>>, %arg9: memref<1x8x256xf32, #tpu.memory_space<vmem>>, %arg10: memref<1x8x256xf32, #tpu.memory_space<vmem>>, %arg11: memref<1x64x256xf32, #tpu.memory_space<vmem>>) attributes {dimension_semantics = [#tpu.dimension_semantics<parallel>, #tpu.dimension_semantics<parallel>], iteration_bounds = array<i64: 2, 1>, scalar_prefetch = 0 : i64, scratch_operands = 0 : i64, tpu.core_type = #tpu.core_type<tc>, window_params = [{transform_indices = @transform_0, window_bounds = array<i64: 1, 64, 256>}, {pipeline_mode = #tpu.pipeline_mode<synchronous>, transform_indices = @transform_1, window_bounds = array<i64: 8, 64>}, {pipeline_mode = #tpu.pipeline_mode<synchronous>, transform_indices = @transform_2, window_bounds = array<i64: 8, 64>}, {pipeline_mode = #tpu.pipeline_mode<synchronous>, transform_indices = @transform_3, window_bounds = array<i64: 64, 64>}, {pipeline_mode = #tpu.pipeline_mode<synchronous>, transform_indices = @transform_4, window_bounds = array<i64: 8, 1>}, {pipeline_mode = #tpu.pipeline_mode<synchronous>, transform_indices = @transform_5, window_bounds = array<i64: 8, 1>}, {pipeline_mode = #tpu.pipeline_mode<synchronous>, transform_indices = @transform_6, window_bounds = array<i64: 64, 1>}, {transform_indices = @transform_7, window_bounds = array<i64: 1, 8, 256>}, {transform_indices = @transform_8, window_bounds = array<i64: 1, 8, 256>}, {transform_indices = @transform_9, window_bounds = array<i64: 1, 64, 256>}]} {
    %c0 = arith.constant 0 : index
    %c0_0 = arith.constant 0 : index
    %c0_1 = arith.constant 0 : index
    %0 = vector.load %arg2[%c0, %c0_0, %c0_1] : memref<1x64x256xf32, #tpu.memory_space<vmem>>, vector<1x64x256xf32>
    %1 = vector.shape_cast %0 : vector<1x64x256xf32> to vector<64x256xf32>
    %c0_2 = arith.constant 0 : index
    %c0_3 = arith.constant 0 : index
    %2 = vector.load %arg3[%c0_2, %c0_3] : memref<8x64xf32, #tpu.memory_space<vmem>>, vector<8x64xf32>
    %cst = arith.constant dense<0.000000e+00> : vector<8x256xf32>
    %3 = tpu.matmul %2, %1, %cst {dimension_numbers = #tpu.dot_dimension_numbers<[1], [0], [0], [1], [0, 0, 1, 1], [], []>} : vector<8x64xf32>, vector<64x256xf32>, vector<8x256xf32> -> vector<8x256xf32>
    %c0_4 = arith.constant 0 : index
    %c0_5 = arith.constant 0 : index
    %4 = vector.load %arg6[%c0_4, %c0_5] : memref<8x1xf32, #tpu.memory_space<vmem>>, vector<8x1xf32>
    %5 = vector.broadcast %4 : vector<8x1xf32> to vector<8x256xf32>
    %6 = arith.addf %3, %5 : vector<8x256xf32>
    %c0_6 = arith.constant 0 : index
    %c0_7 = arith.constant 0 : index
    %c0_8 = arith.constant 0 : index
    %7 = vector.load %arg9[%c0_6, %c0_7, %c0_8] : memref<1x8x256xf32, #tpu.memory_space<vmem>>, vector<1x8x256xf32>
    %8 = vector.shape_cast %7 : vector<1x8x256xf32> to vector<8x256xf32>
    %9 = vector.shape_cast %6 : vector<8x256xf32> to vector<1x8x256xf32>
    tpu.vector_store %arg9[%c0_6, %c0_7, %c0_8], %9 {strides = array<i32>} : memref<1x8x256xf32, #tpu.memory_space<vmem>>, vector<1x8x256xf32>,
    %c0_9 = arith.constant 0 : index
    %c0_10 = arith.constant 0 : index
    %10 = vector.load %arg4[%c0_9, %c0_10] : memref<8x64xf32, #tpu.memory_space<vmem>>, vector<8x64xf32>
    %cst_11 = arith.constant dense<0.000000e+00> : vector<8x256xf32>
    %11 = tpu.matmul %10, %1, %cst_11 {dimension_numbers = #tpu.dot_dimension_numbers<[1], [0], [0], [1], [0, 0, 1, 1], [], []>} : vector<8x64xf32>, vector<64x256xf32>, vector<8x256xf32> -> vector<8x256xf32>
    %c0_12 = arith.constant 0 : index
    %c0_13 = arith.constant 0 : index
    %12 = vector.load %arg7[%c0_12, %c0_13] : memref<8x1xf32, #tpu.memory_space<vmem>>, vector<8x1xf32>
    %13 = vector.broadcast %12 : vector<8x1xf32> to vector<8x256xf32>
    %14 = arith.addf %11, %13 : vector<8x256xf32>
    %c0_14 = arith.constant 0 : index
    %c0_15 = arith.constant 0 : index
    %c0_16 = arith.constant 0 : index
    %15 = vector.load %arg10[%c0_14, %c0_15, %c0_16] : memref<1x8x256xf32, #tpu.memory_space<vmem>>, vector<1x8x256xf32>
    %16 = vector.shape_cast %15 : vector<1x8x256xf32> to vector<8x256xf32>
    %17 = vector.shape_cast %14 : vector<8x256xf32> to vector<1x8x256xf32>
    tpu.vector_store %arg10[%c0_14, %c0_15, %c0_16], %17 {strides = array<i32>} : memref<1x8x256xf32, #tpu.memory_space<vmem>>, vector<1x8x256xf32>,
    %c0_17 = arith.constant 0 : index
    %c0_18 = arith.constant 0 : index
    %18 = vector.load %arg5[%c0_17, %c0_18] : memref<64x64xf32, #tpu.memory_space<vmem>>, vector<64x64xf32>
    %cst_19 = arith.constant dense<0.000000e+00> : vector<64x256xf32>
    %19 = tpu.matmul %18, %1, %cst_19 {dimension_numbers = #tpu.dot_dimension_numbers<[1], [0], [0], [1], [0, 0, 1, 1], [], []>} : vector<64x64xf32>, vector<64x256xf32>, vector<64x256xf32> -> vector<64x256xf32>
    %c0_20 = arith.constant 0 : index
    %c0_21 = arith.constant 0 : index
    %20 = vector.load %arg8[%c0_20, %c0_21] : memref<64x1xf32, #tpu.memory_space<vmem>>, vector<64x1xf32>
    %21 = vector.broadcast %20 : vector<64x1xf32> to vector<64x256xf32>
    %22 = arith.addf %19, %21 : vector<64x256xf32>
    %c0_22 = arith.constant 0 : index
    %c0_23 = arith.constant 0 : index
    %c0_24 = arith.constant 0 : index
    %23 = vector.load %arg11[%c0_22, %c0_23, %c0_24] : memref<1x64x256xf32, #tpu.memory_space<vmem>>, vector<1x64x256xf32>
    %24 = vector.shape_cast %23 : vector<1x64x256xf32> to vector<64x256xf32>
    %25 = vector.shape_cast %22 : vector<64x256xf32> to vector<1x64x256xf32>
    tpu.vector_store %arg11[%c0_22, %c0_23, %c0_24], %25 {strides = array<i32>} : memref<1x64x256xf32, #tpu.memory_space<vmem>>, vector<1x64x256xf32>,
    return
  }
  func.func @transform_0(%arg0: i32, %arg1: i32) -> (i32, i32, i32) {
    %c0_i32 = arith.constant 0 : i32
    %c0_i32_0 = arith.constant 0 : i32
    return %arg0, %c0_i32, %arg1 : i32, i32, i32
  }
  func.func @transform_1(%arg0: i32, %arg1: i32) -> (i32, i32) {
    %c0_i32 = arith.constant 0 : i32
    %c0_i32_0 = arith.constant 0 : i32
    %c0_i32_1 = arith.constant 0 : i32
    return %c0_i32, %c0_i32_0 : i32, i32
  }
  func.func @transform_2(%arg0: i32, %arg1: i32) -> (i32, i32) {
    %c0_i32 = arith.constant 0 : i32
    %c0_i32_0 = arith.constant 0 : i32
    %c0_i32_1 = arith.constant 0 : i32
    return %c0_i32, %c0_i32_0 : i32, i32
  }
  func.func @transform_3(%arg0: i32, %arg1: i32) -> (i32, i32) {
    %c0_i32 = arith.constant 0 : i32
    %c0_i32_0 = arith.constant 0 : i32
    %c0_i32_1 = arith.constant 0 : i32
    return %c0_i32, %c0_i32_0 : i32, i32
  }
  func.func @transform_4(%arg0: i32, %arg1: i32) -> (i32, i32) {
    %c0_i32 = arith.constant 0 : i32
    %c0_i32_0 = arith.constant 0 : i32
    %c0_i32_1 = arith.constant 0 : i32
    return %c0_i32, %c0_i32_0 : i32, i32
  }
  func.func @transform_5(%arg0: i32, %arg1: i32) -> (i32, i32) {
    %c0_i32 = arith.constant 0 : i32
    %c0_i32_0 = arith.constant 0 : i32
    %c0_i32_1 = arith.constant 0 : i32
    return %c0_i32, %c0_i32_0 : i32, i32
  }
  func.func @transform_6(%arg0: i32, %arg1: i32) -> (i32, i32) {
    %c0_i32 = arith.constant 0 : i32
    %c0_i32_0 = arith.constant 0 : i32
    %c0_i32_1 = arith.constant 0 : i32
    return %c0_i32, %c0_i32_0 : i32, i32
  }
  func.func @transform_7(%arg0: i32, %arg1: i32) -> (i32, i32, i32) {
    %c0_i32 = arith.constant 0 : i32
    %c0_i32_0 = arith.constant 0 : i32
    return %arg0, %c0_i32, %arg1 : i32, i32, i32
  }
  func.func @transform_8(%arg0: i32, %arg1: i32) -> (i32, i32, i32) {
    %c0_i32 = arith.constant 0 : i32
    %c0_i32_0 = arith.constant 0 : i32
    return %arg0, %c0_i32, %arg1 : i32, i32, i32
  }
  func.func @transform_9(%arg0: i32, %arg1: i32) -> (i32, i32, i32) {
    %c0_i32 = arith.constant 0 : i32
    %c0_i32_0 = arith.constant 0 : i32
    return %arg0, %c0_i32, %arg1 : i32, i32, i32
  }
}

</mosaic_0001>

<bundles_post_ra>
// kernel: tpu_custom_call.1
= control target key start
LH: loop header
LB: loop body
LE: loop exit
PB: predicated region body
PF: predicated region fallthrough
CT: control target
= control target key end

     0   :  { %s1775_s0 = inlined_call_operand.hbm [shape: f32[2,64,256], index: 0, kind: input, shape index: {}]   ;;  %s1776_s1 = inlined_call_operand.vmem [shape: f32[8,64], index: 1, kind: input, shape index: {}]   ;;  %s1777_s2 = inlined_call_operand.vmem [shape: f32[8,64], index: 2, kind: input, shape index: {}]   ;;  %s1778_s3 = inlined_call_operand.vmem [shape: f32[64,64], index: 3, kind: input, shape index: {}]   ;;  %s1779_s4 = inlined_call_operand.vmem [shape: f32[8,1], index: 4, kind: input, shape index: {}]   ;;  %s1780_s5 = inlined_call_operand.vmem [shape: f32[8,1], index: 5, kind: input, shape index: {}]   ;;  %s1781_s6 = inlined_call_operand.vmem [shape: f32[64,1], index: 6, kind: input, shape index: {}]   ;;  %s1782_s7 = inlined_call_operand.hbm [shape: f32[2,8,256], index: 7, kind: output, shape index: {0}]   ;;  %s1783_s8 = inlined_call_operand.hbm [shape: f32[2,8,256], index: 8, kind: output, shape index: {1}]   ;;  %s1784_s9 = inlined_call_operand.hbm [shape: f32[2,64,256], index: 9, kind: output, shape index: {2}]  }
   0x1   :  { %1791 = sst [smem:[#allocation14_spill]] %s1775_s0 }
   0x2   :  { %15 = vsyncpa [#allocation3], 0 }
   0x3   :  { %17 = vsyncpa [#allocation3 + $0x1], 0 }
   0x4   :  { %18 = vsyncpa [#allocation4], 0 }
   0x5   :  { %20 = vsyncpa [#allocation4 + $0x1], 0 }
   0x6   :  { %21 = vsyncpa [#allocation7], 0 }
   0x7   :  { %23 = vsyncpa [#allocation7 + $0x1], 0  ;;  %s1398_s30 = smov 0   ;;  %s1400_s10 = smov 0  }
   0x8   :  { %s1402_s11 = smov 0   ;;  %s1404_s12 = smov 0  }
   0x9   :  { %s1406_s13 = smov 0   ;;  %s1408_s14 = smov 0  }
   0xa LB: > { %1792 = sst [smem:[#allocation12_spill]] %s1332_s13  ;;  %s1429_s15 = sadd.s32 4294967295, %s1336_s14   ;;  %s1336_s14 = sphi %s1408_s14, %s29_s14   ;;  %s1332_s13 = sphi %s1406_s13, %s1808_s13   ;;  %s1328_s12 = sphi %s1404_s12, %s1807_s12   ;;  %s1324_s11 = sphi %s1402_s11, %s1811_s11   ;;  %s1320_s10 = sphi %s1400_s10, %s1810_s10   ;;  %s1316_s30 = sphi %s1398_s30, %s1809_s30  }
   0xb   : > { %s1785_s16 = sadd.s32 4294967294, %s1336_s14   ;;  %s41_s17 = sadd.s32 1, %s1332_s13 }
   0xc   : > { %s50_s18 = sadd.s32 1, %s1324_s11  ;;  %p43_p0 = scmp.ge.s32.totalorder %s41_s17, 2 }
   0xd   : > { %p57_p1 = scmp.ne.s32.totalorder %s1324_s11, %s1320_s10  ;;  %p58_p2 = scmp.eq.s32.totalorder %s1336_s14, 0 }
   0xe   : > { %p63_p3 = scmp.ne.s32.totalorder %s1320_s10, %s1316_s30  ;;  %s1813_s17 = smov (%p43_p0, %s41_s17), 0 }
   0xf   : > { %1793 = sst [smem:[#allocation13_spill]] %s1813_s17  ;;  %p1441_p4 = por %p58_p2, %p57_p1 }
  0x10   : > { %p64_p5 = scmp.eq.s32.totalorder %s1429_s15, 0  ;;  %s45_s20 = ssub.s32 %s1332_s13, %s1813_s17 }
  0x11   : > { %p215_p6 = scmp.eq.s32.totalorder %s1429_s15, 1  ;;  %p48_p7 = scmp.eq.s32.totalorder %s45_s20, 0 }
  0x12   : > { %p1449_p8 = por %p64_p5, %p63_p3  ;;  %p221_p10 = scmp.eq.s32.totalorder %s1785_s16, 1 }
  0x13   : > { %p1453_p9 = por %p215_p6, %p57_p1  ;;  %p1106_p13 = scmp.lt.s32.totalorder %s1336_s14, 2 }
  0x14   : > { %s1460_s23 = scalar_select %p48_p7, %s1324_s11, %s50_s18  }
  0x15   : > { %s1796_s22 = scalar_select %p1453_p9, 1, 0 }
  0x16   : > { %p1462_p11 = por %p221_p10, %p63_p3  ;;  %s315_s25 = sand.u32 1, %s1324_s11  }
  0x17   : > { %s1003_s26 = sshll.u32 %s315_s25, 7  ;;  %s1032_s27 = sshll.u32 %s1332_s13, 11 }
  0x18   : > { %s1797_s24 = scalar_select %p1462_p11, 1, 0 }
  0x19   : > { %s1798_s0 = sld [smem:[#allocation14_spill]]  ;;  %s319_s18 = scalar_lea.vmem [#allocation2], %s1003_s26 }
  0x1a   : > { %s328_s16 = sshll.u32 %s319_s18, 4  ;;  %p1479_p0 = pnand %p1106_p13, %p1441_p4  ;;  %s1475_s16 = int_to_ptr.vmem [resolvable:$true] %s328_s16 }
  0x1b   : > { %s1484_s13 = scalar_lea.sflag [#allocation3], %s315_s25 }
  0x1c   : > { %p1166_p3 = pneg %p1479_p0 }
  0x1f   : > { %s1473_s20 = scalar_lea.hbm %s1798_s0, %s1032_s27  ;;  %s1169_s19 = scalar_lea.hbm %s1798_s0, 4096 }
  0x20   : > { %s1164_s27 = scalar_lea.hbm %s1473_s20, 2048  ;;  %p1170_p4 = scmp.lt.u32.totalorder %s1473_s20, %s1798_s0 }
  0x21   : > { %p1165_p2 = scmp.ne.s32.totalorder %s1473_s20, %s1164_s27  ;;  %p1171_p7 = scmp.lt.u32.totalorder %s1169_s19, %s1164_s27 }
  0x22   : > { %p1173_p13 = scmp.lt.u32.totalorder %s1164_s27, %s1473_s20 }
  0x23   : > { %p1167_p5 = pnand %p1166_p3, %p1165_p2  ;;  %p1172_p10 = por %p1171_p7, %p1170_p4 }
  0x25   : > { %p1168_p6 = pneg %p1167_p5  ;;  %p1174_p12 = por %p1173_p13, %p1172_p10 }
  0x27   : > { %p1175_p1 = pnand %p1174_p12, %p1168_p6 }
  0x29   : > { %1178 = shalt.err (!%p1175_p1)
}
  0x2a   : > { %s1179_s25 = scalar_lea.vmem %s1475_s16, 2048  ;;  %s1338_s26 = smov [#allocation2]  }
  0x2b   : > { %p1180_p2 = scmp.ne.s32.totalorder %s1475_s16, %s1179_s25  ;;  %s1184_s28 = sshll.u32 %s1338_s26, 4  ;;  %s1185_s28 = int_to_ptr.vmem [resolvable:$false] %s1184_s28 }
  0x2c   : > { %s1186_s29 = scalar_lea.vmem %s1185_s28, 4096  ;;  %p1187_p9 = scmp.lt.s32.totalorder %s1475_s16, %s1185_s28 }
  0x2d   : > { %p1182_p5 = pnand %p1180_p2, %p1166_p3  ;;  %p1188_p4 = scmp.lt.s32.totalorder %s1186_s29, %s1179_s25 }
  0x2f   : > { %p1183_p11 = pneg %p1182_p5  ;;  %p1189_p7 = por %p1188_p4, %p1187_p9 }
  0x31   : > { %p1190_p10 = pnand %p1189_p7, %p1183_p11 }
  0x33   : > { %1193 = shalt.err (!%p1190_p10)
}
  0x34   : > { %s1339_s27 = smov 256   ;;  %s1340_s19 = smov 16  }
  0x35   : > { %1095 = dma.hbm_to_vmem [thread:$0]  (!%p1479_p0), %s1473_s20, 2048, %s1475_s16, %s1484_s13, %s1339_s27, %s1339_s27, %s1340_s19  }
  0x36   : > { %p336_p12 = scmp.lt.s32.totalorder %s1336_s14, 3  ;;  %p1800_p1 = scmp.ge.s32.totalorder %s1336_s14, 1 }
  0x38   : > { %p337_p3 = pnand %p1800_p1, %p336_p12 }
  0x39   : > { %s1516_s18 = sand.u32 (!%p337_p3), 1, %s1320_s10  }
  0x3a   : > { %340 = sbr.rel (%p337_p3) target bundleno = 366 (0x16e), region = 48  ;;  %s1007_s25 = sshll.u32 (!%p337_p3), %s1516_s18, 7 }
  0x3b   : > { %s343_s26 = scalar_lea.sflag (!%p337_p3), [#allocation3], %s1516_s18  ;;  %s1522_s28 = scalar_lea.vmem (!%p337_p3), [#allocation2], %s1007_s25 }
  0x41   : > { %1303 = dma.done.wait (%p1449_p8), %s343_s26, 2048  }
  0x42   : > { %1305 = vsyncadd (%p1449_p8), %s343_s26, 4294965248  ;;  %v1341_v0 = vmov 0.0   ;;  %v1342_v1 = vmov 0   ;;  %v396_v2 = vld [vmem:[%s1522_s28 + $0x8] sm:$0xff]  ;;  %v398_v3 = vld [vmem:[%s1522_s28 + $0x18] sm:$0xff]  ;;  %vm418_vm0 = vcmask 523264  }
  0x43   : > { %722 = vmatprep.mubr.f32.mxu0 %v1341_v0  ;;  %486 = vmatprep.mubr.f32.mxu1 %v1341_v0  ;;  %v395_v4 = vld [vmem:[%s1522_s28] sm:$0xff]  ;;  %v1036_v5 = vpack.c.bf16 %v398_v3, %v396_v2  ;;  %v397_v6 = vld [vmem:[%s1522_s28 + $0x10] sm:$0xff]  ;;  %v400_v7 = vld [vmem:[%s1522_s28 + $0x28] sm:$0xff]  ;;  %s1790_s13 = sshll.u32 %s1516_s18, 4  ;;  %s1789_s16 = sshll.u32 %s1328_s12, 8 }
  0x44   : > { %1163 = vset.pattern.permute.xlu1 %v1342_v1  ;;  %1162 = vset.pattern.permute.xlu0 %v1342_v1  ;;  %v402_v8 = vld [vmem:[%s1522_s28 + $0x38] sm:$0xff]  ;;  %v1038_v9 = vpack.c.bf16 %v397_v6, %v395_v4  ;;  %v399_v11 = vld [vmem:[%s1522_s28 + $0x20] sm:$0xff]  ;;  %v401_v12 = vld [vmem:[%s1522_s28 + $0x30] sm:$0xff]  ;;  %s376_s17 = scalar_lea.vmem [#allocation5], %s1790_s13  ;;  %s1635_s27 = scalar_lea.hbm %s1782_s7, %s1789_s16 }
  0x45   : > { %v1040_v10 = vpack.c.bf16 %v402_v8, %v400_v7  ;;  %v404_v13 = vld [vmem:[%s1522_s28 + $0x48] sm:$0xff]  ;;  %1037 = vmatprep.subr.bf16.mxu1 %v1036_v5  ;;  %1069 = vmatprep.subr.bf16.mxu0 %v1036_v5  ;;  %v406_v14 = vld [vmem:[%s1522_s28 + $0x58] sm:$0xff]  ;;  %v1042_v15 = vpack.c.bf16 %v401_v12, %v399_v11  ;;  %v403_v17 = vld [vmem:[%s1522_s28 + $0x40] sm:$0xff]  ;;  %s814_s21 = sshll.u32 %s376_s17, 4  ;;  %s1641_s19 = scalar_lea.vmem [#allocation8], %s1007_s25  ;;  %s1637_s21 = int_to_ptr.vmem [resolvable:$true] %s814_s21 }
  0x46   : > { %1039 = vmatpush1.bf16.msra.mxu1 %v1038_v9  ;;  %1071 = vmatpush1.bf16.msra.mxu0 %v1038_v9  ;;  %v1044_v16 = vpack.c.bf16 %v406_v14, %v404_v13  ;;  %v405_v18 = vld [vmem:[%s1522_s28 + $0x50] sm:$0xff]  ;;  %v408_v19 = vld [vmem:[%s1522_s28 + $0x68] sm:$0xff]  ;;  %v410_v20 = vld [vmem:[%s1522_s28 + $0x78] sm:$0xff]  ;;  %s788_s26 = scalar_lea.sflag [#allocation4], %s1516_s18  ;;  %p1801_p9 = scmp.ne.s32.totalorder %s1796_s22, 0 }
  0x47   : > { %1041 = vmatprep.subr.bf16.mxu1 %v1040_v10  ;;  %1073 = vmatprep.subr.bf16.mxu0 %v1040_v10  ;;  %v1046_v21 = vpack.c.bf16 %v405_v18, %v403_v17  ;;  %v586_v22 = vld [vmem:[%s1781_s6] sm:$0xff]  ;;  %v1048_v23 = vpack.c.bf16 %v410_v20, %v408_v19  ;;  %v409_v25 = vld [vmem:[%s1522_s28 + $0x70] sm:$0xff]  ;;  %v587_v27 = vld [vmem:[%s1781_s6 + $0x8] sm:$0xff]  ;;  %s1343_s20 = smov [#allocation5]  }
  0x48   : > { %v407_v24 = vld [vmem:[%s1522_s28 + $0x60] sm:$0xff]  ;;  %596 = vperm.xlu1 %1163, %v586_v22   ;;  %v589_v30 = vld [vmem:[%s1781_s6 + $0x18] sm:$0xff]  ;;  %v588_v31 = vld [vmem:[%s1781_s6 + $0x10] sm:$0xff]  ;;  %s1194_s28 = scalar_lea.vmem %s1637_s21, 256  ;;  %s1198_s25 = sshll.u32 %s1343_s20, 4  ;;  %s1199_s25 = int_to_ptr.vmem [resolvable:$false] %s1198_s25 }
  0x49   : > { %v496_v26 = vld [vmem:[%s1780_s5] sm:$0xff]  ;;  %v1050_v29 = vpack.c.bf16 %v409_v25, %v407_v24  ;;  %v591_v34 = vld [vmem:[%s1781_s6 + $0x28] sm:$0xff]  ;;  %v593_v37 = vld [vmem:[%s1781_s6 + $0x38] sm:$0xff]  ;;  %p1195_p8 = scmp.ne.s32.totalorder %s1637_s21, %s1194_s28  ;;  %s1200_s29 = scalar_lea.vmem %s1199_s25, 512 }
  0x4a   : > { %1043 = vmatpush1.bf16.msra.mxu1 %v1042_v15  ;;  %1075 = vmatpush1.bf16.msra.mxu0 %v1042_v15  ;;  %v412_v28 = vld [vmem:[%s1779_s4] sm:$0xff]  ;;  %v579_v36 = vld [vmem:[%s1778_s3 + $0x8] sm:$0xff]  ;;  %v592_v38 = vld [vmem:[%s1781_s6 + $0x30] sm:$0xff]  ;;  %p1201_p6 = scmp.lt.s32.totalorder %s1637_s21, %s1199_s25  ;;  %p1202_p13 = scmp.lt.s32.totalorder %s1200_s29, %s1194_s28 }
  0x4b   : > { %1045 = vmatprep.subr.bf16.mxu1 %v1044_v16  ;;  %1077 = vmatprep.subr.bf16.mxu0 %v1044_v16  ;;  %v578_v32 = vld [vmem:[%s1778_s3] sm:$0xff]  ;;  %v580_v39 = vld [vmem:[%s1778_s3 + $0x10] sm:$0xff]  ;;  %v581_v40 = vld [vmem:[%s1778_s3 + $0x18] sm:$0xff]  ;;  %p1196_p11 = pnand %p1195_p8, %p1801_p9 }
  0x4c   : > { %499 = vperm.xlu0 %1162, %v496_v26   ;;  %601 = vperm.xlu1 %1163, %v587_v27   ;;  %v411_v33 = vld [vmem:[%s1776_s1] sm:$0xff]  ;;  %v583_v43 = vld [vmem:[%s1778_s3 + $0x28] sm:$0xff]  ;;  %v584_v44 = vld [vmem:[%s1778_s3 + $0x30] sm:$0xff]  ;;  %p1203_p2 = por %p1202_p13, %p1201_p6 }
  0x4d   : > { %v590_v35 = vld [vmem:[%s1781_s6 + $0x20] sm:$0xff]  ;;  %v585_v45 = vld [vmem:[%s1778_s3 + $0x38] sm:$0xff]  ;;  %p1197_p0 = pneg %p1196_p11 }
  0x4e   : > { %1047 = vmatpush1.bf16.msra.mxu1 %v1046_v21  ;;  %1079 = vmatpush1.bf16.msra.mxu0 %v1046_v21  ;;  %v495_v41 = vld [vmem:[%s1777_s2] sm:$0xff] }
  0x4f   : > { %1049 = vmatprep.subr.bf16.mxu1 %v1048_v23  ;;  %1081 = vmatprep.subr.bf16.mxu0 %v1048_v23  ;;  %v582_v42 = vld [vmem:[%s1778_s3 + $0x20] sm:$0xff]  ;;  %p1204_p5 = pnand %p1203_p2, %p1197_p0 }
  0x50   : > { %415 = vperm.xlu0 %1162, %v412_v28   ;;  %611 = vperm.xlu1 %1163, %v589_v30  }
  0x52   : > { %1051 = vmatpush1.bf16.msra.mxu1 %v1050_v29  ;;  %1083 = vmatpush1.bf16.msra.mxu0 %v1050_v29 }
  0x53   : > { %1053 = vmatprep.subr.bf16.mxu1 %v1036_v5 }
  0x54   : > { %606 = vperm.xlu0 %1162, %v588_v31   ;;  %621 = vperm.xlu1 %1163, %v591_v34  }
  0x55   : > { %1013 = vmatmul.mubr.msk.f32.vlgmr.msra.gmra.mrb[0].mxu0 %vm418_vm0, %v578_v32  ;;  %1011 = vmatmul.mubr.msk.f32.vlgmr.msra.gmra.mrb[0].mxu1 %vm418_vm0, %v411_v33 }
  0x56   : > { %1055 = vmatpush1.bf16.msra.mxu1 %v1038_v9  ;;  %728 = vmatprep.mubr.f32.mxu0 %v1341_v0 }
  0x57   : > { %1057 = vmatprep.subr.bf16.mxu1 %v1040_v10  ;;  %569 = vmatprep.mubr.f32.mxu1 %v1341_v0 }
  0x58   : > { %616 = vperm.xlu0 %1162, %v590_v35   ;;  %631 = vperm.xlu1 %1163, %v593_v37  }
  0x59   : > { %1014 = vmatmul.mubr.msk.f32.gmra.mrb[2].mxu0 %vm418_vm0, %v579_v36 }
  0x5a   : > { %1059 = vmatpush1.bf16.msra.mxu1 %v1042_v15  ;;  %734 = vmatprep.mubr.f32.mxu0 %v1341_v0 }
  0x5b   : > { %1061 = vmatprep.subr.bf16.mxu1 %v1044_v16 }
  0x5c   : > { %626 = vperm.xlu0 %1162, %v592_v38  }
  0x5d   : > { %1015 = vmatmul.mubr.msk.f32.gmra.mrb[4].mxu0 %vm418_vm0, %v580_v39 }
  0x5e   : > { %1063 = vmatpush1.bf16.msra.mxu1 %v1046_v21  ;;  %740 = vmatprep.mubr.f32.mxu0 %v1341_v0 }
  0x5f   : > { %1065 = vmatprep.subr.bf16.mxu1 %v1048_v23 }
  0x61   : > { %1016 = vmatmul.mubr.msk.f32.gmra.mrb[6].mxu0 %vm418_vm0, %v581_v40 }
  0x62   : > { %1067 = vmatpush1.bf16.msra.mxu1 %v1050_v29  ;;  %746 = vmatprep.mubr.f32.mxu0 %v1341_v0 }
  0x65   : > { %1012 = vmatmul.mubr.msk.f32.vlgmr.msra.gmra.mrb[2].mxu1 %vm418_vm0, %v495_v41  ;;  %1017 = vmatmul.mubr.msk.f32.gmra.mrb[8].mxu0 %vm418_vm0, %v582_v42 }
  0x66   : > { %752 = vmatprep.mubr.f32.mxu0 %v1341_v0 }
  0x69   : > { %1018 = vmatmul.mubr.msk.f32.gmra.mrb[10].mxu0 %vm418_vm0, %v583_v43 }
  0x6a   : > { %758 = vmatprep.mubr.f32.mxu0 %v1341_v0 }
  0x6d   : > { %1019 = vmatmul.mubr.msk.f32.gmra.mrb[12].mxu0 %vm418_vm0, %v584_v44 }
  0x6e   : > { %764 = vmatprep.mubr.f32.mxu0 %v1341_v0 }
  0x71   : > { %1020 = vmatmul.mubr.msk.f32.gmra.mrb[14].mxu0 %vm418_vm0, %v585_v45 }
  0xc7   : > { %v597_v47 = vpop.permute.xlu1 %596 }
  0xcb   : > { %v1624_v46 = vpop.permute.xlu0 %499  ;;  %v602_v57 = vpop.permute.xlu1 %601 }
  0xcf   : > { %v416_v48 = vpop.permute.xlu0 %415 }
 0x128   : > { %v724_v49 = vpop.f32.mrb[0].mxu0  ;;  %v488_v50 = vpop.f32.mrb[0].mxu1 }
 0x129   : > { %v725_v51 = vadd.f32 %v724_v49, %v597_v47  ;;  %v726_v52 = vpop.f32.mrb[1].mxu0  ;;  %v489_v53 = vadd.f32 %v488_v50, %v416_v48  ;;  %v490_v54 = vpop.f32.mrb[1].mxu1 }
 0x12a   : > { %v727_v55 = vadd.f32 %v726_v52, %v597_v47  ;;  %v491_v56 = vadd.f32 %v490_v54, %v416_v48 }
 0x12b   : > { %771 = vst [vmem:[%s1641_s19] sm:$0xff] %v725_v51  ;;  %493 = vst [vmem:[%s376_s17] sm:$0xff] %v489_v53 }
 0x12c   : > { %772 = vst [vmem:[%s1641_s19 + $0x8] sm:$0xff] %v727_v55  ;;  %v730_v58 = vpop.f32.mrb[2].mxu0  ;;  %494 = vst [vmem:[%s376_s17 + $0x8] sm:$0xff] %v491_v56 }
 0x12d   : > { %v731_v59 = vadd.f32 %v730_v58, %v602_v57  ;;  %v732_v60 = vpop.f32.mrb[3].mxu0 }
 0x12e   : > { %1207 = shalt.err (!%p1204_p5)
}
 0x12f   : > { %s1208_s17 = scalar_lea.hbm %s1635_s27, 256  ;;  %s1212_s20 = scalar_lea.hbm %s1782_s7, 512 }
 0x130   : > { %p1209_p4 = scmp.ne.s32.totalorder %s1635_s27, %s1208_s17  ;;  %p1213_p12 = scmp.lt.u32.totalorder %s1635_s27, %s1782_s7 }
 0x131   : > { %p1214_p1 = scmp.lt.u32.totalorder %s1212_s20, %s1208_s17  ;;  %p1216_p8 = scmp.lt.u32.totalorder %s1208_s17, %s1635_s27 }
 0x132   : > { %p1210_p7 = pnand %p1209_p4, %p1801_p9 }
 0x133   : > { %p1215_p3 = por %p1214_p1, %p1213_p12 }
 0x134   : > { %p1211_p10 = pneg %p1210_p7 }
 0x135   : > { %p1217_p11 = por %p1216_p8, %p1215_p3 }
 0x137   : > { %p1218_p0 = pnand %p1217_p11, %p1211_p10 }
 0x139   : > { %1221 = shalt.err (!%p1218_p0)
}
 0x13a   : > { %1086 = dma.vmem_to_hbm [thread:$0]  (%p1801_p9), %s1637_s21, 256, %s1635_s27, %s788_s26   ;;  %v733_v61 = vadd.f32 %v732_v60, %v602_v57  ;;  %773 = vst [vmem:[%s1641_s19 + $0x10] sm:$0xff] %v731_v59  ;;  %v607_v62 = vpop.permute.xlu0 %606  ;;  %v736_v63 = vpop.f32.mrb[4].mxu0 }
 0x13b   : > { %v737_v0 = vadd.f32 %v736_v63, %v607_v62  ;;  %v738_v1 = vpop.f32.mrb[5].mxu0  ;;  %v612_v3 = vpop.permute.xlu1 %611  ;;  %s792_s0 = sand.u32 1, %s1429_s15   ;;  %s1802_s13 = sshll.u32 %s1516_s18, 4 }
 0x13c   : > { %774 = vst [vmem:[%s1641_s19 + $0x18] sm:$0xff] %v733_v61  ;;  %v739_v2 = vadd.f32 %v738_v1, %v607_v62  ;;  %v742_v4 = vpop.f32.mrb[6].mxu0  ;;  %s383_s16 = scalar_lea.vmem [#allocation6], %s1802_s13  ;;  %v571_v9 = vpop.f32.mrb[2].mxu1  ;;  %s1803_s15 = sshll.u32 %s1328_s12, 8 }
 0x13d   : > { %775 = vst [vmem:[%s1641_s19 + $0x20] sm:$0xff] %v737_v0  ;;  %v743_v5 = vadd.f32 %v742_v4, %v612_v3  ;;  %v744_v6 = vpop.f32.mrb[7].mxu0  ;;  %s830_s21 = sshll.u32 %s383_s16, 4  ;;  %v572_v11 = vadd.f32 %v571_v9, %v1624_v46  ;;  %v573_v13 = vpop.f32.mrb[3].mxu1  ;;  %s1683_s18 = scalar_lea.hbm %s1783_s8, %s1803_s15  ;;  %s1685_s21 = int_to_ptr.vmem [resolvable:$true] %s830_s21 }
 0x13e   : > { %776 = vst [vmem:[%s1641_s19 + $0x28] sm:$0xff] %v739_v2  ;;  %v745_v7 = vadd.f32 %v744_v6, %v612_v3  ;;  %v617_v8 = vpop.permute.xlu0 %616  ;;  %v748_v10 = vpop.f32.mrb[8].mxu0  ;;  %v574_v15 = vadd.f32 %v573_v13, %v1624_v46  ;;  %s1689_s28 = scalar_lea.sflag [#allocation7], %s792_s0  ;;  %s1222_s29 = scalar_lea.vmem %s1685_s21, 256 }
 0x13f   : > { %777 = vst [vmem:[%s1641_s19 + $0x30] sm:$0xff] %v743_v5  ;;  %v749_v12 = vadd.f32 %v748_v10, %v617_v8  ;;  %v750_v14 = vpop.f32.mrb[9].mxu0  ;;  %576 = vst [vmem:[%s383_s16] sm:$0xff] %v572_v11  ;;  %v622_v17 = vpop.permute.xlu1 %621  ;;  %p1223_p6 = scmp.ne.s32.totalorder %s1685_s21, %s1222_s29  ;;  %s1344_s17 = smov [#allocation6]  }
 0x140   : > { %778 = vst [vmem:[%s1641_s19 + $0x38] sm:$0xff] %v745_v7  ;;  %v751_v16 = vadd.f32 %v750_v14, %v617_v8  ;;  %577 = vst [vmem:[%s383_s16 + $0x8] sm:$0xff] %v574_v15  ;;  %v754_v18 = vpop.f32.mrb[10].mxu0  ;;  %s1226_s20 = sshll.u32 %s1344_s17, 4  ;;  %s1227_s20 = int_to_ptr.vmem [resolvable:$false] %s1226_s20 }
 0x141   : > { %779 = vst [vmem:[%s1641_s19 + $0x40] sm:$0xff] %v749_v12  ;;  %v755_v19 = vadd.f32 %v754_v18, %v622_v17  ;;  %v756_v20 = vpop.f32.mrb[11].mxu0  ;;  %p1224_p13 = pnand %p1223_p6, %p1801_p9  ;;  %s1228_s25 = scalar_lea.vmem %s1227_s20, 512 }
 0x142   : > { %780 = vst [vmem:[%s1641_s19 + $0x48] sm:$0xff] %v751_v16  ;;  %p1229_p5 = scmp.lt.s32.totalorder %s1685_s21, %s1227_s20  ;;  %p1230_p4 = scmp.lt.s32.totalorder %s1228_s25, %s1222_s29 }
 0x143   : > { %p1225_p2 = pneg %p1224_p13 }
 0x144   : > { %p1231_p7 = por %p1230_p4, %p1229_p5 }
 0x146   : > { %p1232_p10 = pnand %p1231_p7, %p1225_p2 }
 0x148   : > { %1235 = shalt.err (!%p1232_p10)
}
 0x149   : > { %s1236_s0 = scalar_lea.hbm %s1683_s18, 256  ;;  %s1240_s15 = scalar_lea.hbm %s1783_s8, 512 }
 0x14a   : > { %p1237_p12 = scmp.ne.s32.totalorder %s1683_s18, %s1236_s0  ;;  %p1241_p8 = scmp.lt.u32.totalorder %s1683_s18, %s1783_s8 }
 0x14b   : > { %p1242_p11 = scmp.lt.u32.totalorder %s1240_s15, %s1236_s0  ;;  %p1244_p6 = scmp.lt.u32.totalorder %s1236_s0, %s1683_s18 }
 0x14c   : > { %p1238_p1 = pnand %p1237_p12, %p1801_p9 }
 0x14d   : > { %p1243_p0 = por %p1242_p11, %p1241_p8 }
 0x14e   : > { %p1239_p3 = pneg %p1238_p1 }
 0x14f   : > { %p1245_p13 = por %p1244_p6, %p1243_p0 }
 0x151   : > { %p1246_p2 = pnand %p1245_p13, %p1239_p3 }
 0x153   : > { %1249 = shalt.err (!%p1246_p2)
}
 0x154   : > { %1087 = dma.vmem_to_hbm [thread:$0]  (%p1801_p9), %s1685_s21, 256, %s1683_s18, %s1689_s28   ;;  %v757_v21 = vadd.f32 %v756_v20, %v622_v17  ;;  %781 = vst [vmem:[%s1641_s19 + $0x50] sm:$0xff] %v755_v19  ;;  %v627_v22 = vpop.permute.xlu0 %626  ;;  %v760_v23 = vpop.f32.mrb[12].mxu0 }
 0x155   : > { %v761_v24 = vadd.f32 %v760_v23, %v627_v22  ;;  %v762_v25 = vpop.f32.mrb[13].mxu0  ;;  %s1035_s29 = sshll.u32 %s1328_s12, 11  ;;  %s845_s17 = sshll.u32 %s1641_s19, 4  ;;  %v632_v27 = vpop.permute.xlu1 %631  ;;  %s1724_s17 = int_to_ptr.vmem [resolvable:$true] %s845_s17 }
 0x156   : > { %782 = vst [vmem:[%s1641_s19 + $0x58] sm:$0xff] %v757_v21  ;;  %v763_v26 = vadd.f32 %v762_v25, %v627_v22  ;;  %v766_v28 = vpop.f32.mrb[14].mxu0  ;;  %s1722_s20 = scalar_lea.hbm %s1784_s9, %s1035_s29  ;;  %s1250_s12 = scalar_lea.vmem %s1724_s17, 2048 }
 0x157   : > { %783 = vst [vmem:[%s1641_s19 + $0x60] sm:$0xff] %v761_v24  ;;  %v767_v29 = vadd.f32 %v766_v28, %v632_v27  ;;  %v768_v30 = vpop.f32.mrb[15].mxu0  ;;  %p1251_p5 = scmp.ne.s32.totalorder %s1724_s17, %s1250_s12  ;;  %s1345_s25 = smov [#allocation8]  }
 0x158   : > { %784 = vst [vmem:[%s1641_s19 + $0x68] sm:$0xff] %v763_v26  ;;  %v769_v31 = vadd.f32 %v768_v30, %v632_v27  ;;  %s1254_s0 = sshll.u32 %s1345_s25, 4  ;;  %s1255_s0 = int_to_ptr.vmem [resolvable:$false] %s1254_s0 }
 0x159   : > { %785 = vst [vmem:[%s1641_s19 + $0x70] sm:$0xff] %v767_v29  ;;  %p1252_p4 = pnand %p1251_p5, %p1801_p9  ;;  %s1256_s13 = scalar_lea.vmem %s1255_s0, 4096 }
 0x15a   : > { %786 = vst [vmem:[%s1641_s19 + $0x78] sm:$0xff] %v769_v31  ;;  %p1257_p10 = scmp.lt.s32.totalorder %s1724_s17, %s1255_s0  ;;  %p1258_p12 = scmp.lt.s32.totalorder %s1256_s13, %s1250_s12 }
 0x15b   : > { %p1253_p7 = pneg %p1252_p4 }
 0x15c   : > { %p1259_p1 = por %p1258_p12, %p1257_p10 }
 0x15e   : > { %p1260_p3 = pnand %p1259_p1, %p1253_p7 }
 0x160   : > { %1263 = shalt.err (!%p1260_p3)
}
 0x161   : > { %s1264_s19 = scalar_lea.hbm %s1722_s20, 2048  ;;  %s1268_s27 = scalar_lea.hbm %s1784_s9, 4096 }
 0x162   : > { %p1265_p8 = scmp.ne.s32.totalorder %s1722_s20, %s1264_s19  ;;  %p1269_p6 = scmp.lt.u32.totalorder %s1722_s20, %s1784_s9 }
 0x163   : > { %p1270_p13 = scmp.lt.u32.totalorder %s1268_s27, %s1264_s19  ;;  %p1272_p5 = scmp.lt.u32.totalorder %s1264_s19, %s1722_s20 }
 0x164   : > { %p1266_p11 = pnand %p1265_p8, %p1801_p9 }
 0x165   : > { %p1271_p2 = por %p1270_p13, %p1269_p6 }
 0x166   : > { %p1267_p0 = pneg %p1266_p11 }
 0x167   : > { %p1273_p4 = por %p1272_p5, %p1271_p2 }
 0x169   : > { %p1274_p7 = pnand %p1273_p4, %p1267_p0 }
 0x16b   : > { %1277 = shalt.err (!%p1274_p7)
}
 0x16c   : > { %s1346_s21 = smov 256   ;;  %s1347_s18 = smov 16  }
 0x16d   : > { %1088 = dma.vmem_to_hbm [thread:$0]  (%p1801_p9), %s1724_s17, 2048, %s1722_s20, %s1689_s28, %s1346_s21, %s1346_s21, %s1347_s18  }
 0x16e PF: > { %s860_s12 = sand.u32 1, %s1316_s30   ;;  %p1804_p10 = scmp.ne.s32.totalorder %s1797_s24, 0 }
 0x16f   : > { %p1805_p12 = scmp.ge.s32.totalorder %s1336_s14, 2  ;;  %s861_s25 = scalar_lea.sflag [#allocation4], %s860_s12 }
 0x171   : > { %p1097_p1 = pnand %p1805_p12, %p1804_p10 }
 0x173   : > { %1307 = dma.done.wait (!%p1097_p1), %s861_s25, 256  }
 0x174   : > { %1309 = vsyncadd (!%p1097_p1), %s861_s25, 4294967040  ;;  %s1806_s0 = sadd.s32 4294967294, %s1336_s14  }
 0x175   : > { %s869_s13 = sand.u32 1, %s1806_s0  }
 0x176   : > { %s870_s19 = scalar_lea.sflag [#allocation7], %s869_s13 }
 0x177   : > { %1311 = dma.done.wait (!%p1097_p1), %s870_s19, 2304  }
 0x178   : > { %1313 = vsyncadd (!%p1097_p1), %s870_s19, 4294964992  ;;  %s29_s14 = sadd.s32 1, %s1336_s14   ;;  %s1807_s12 = sld [smem:[#allocation12_spill]] }
 0x179   : > { %p26_p9 = scmp.ge.s32.totalorder %s29_s14, 4   ;;  %s1808_s13 = sld [smem:[#allocation13_spill]] }
 0x17a   : > { %s1809_s30 = smov %s1320_s10  ;;  %s1810_s10 = smov %s1324_s11 }
 0x17b   : > { %s1811_s11 = smov %s1460_s23  ;;  %28 = sbr.rel (!%p26_p9) target bundleno = 10 (0xa), region = 125 }
 0x182   :  { %884 = vsyncpa [#allocation3], 1 }
 0x183   :  { %886 = vsyncpa [#allocation3 + $0x1], 1 }
 0x184   :  { %887 = vsyncpa [#allocation4], 1 }
 0x185   :  { %889 = vsyncpa [#allocation4 + $0x1], 1 }
 0x186   :  { %890 = vsyncpa [#allocation7], 1 }
 0x187   :  { %892 = vsyncpa [#allocation7 + $0x1], 1 }

</bundles_post_ra>
